<compile_context>
chip_gen: v7x
topology: tpu7x:2x2x1
jax: 0.10.0
libtpu: 0.0.40
codegen_flags: <defaults>
</compile_context>

<pallas_src>
import jax
import jax.numpy as jnp
from jax.experimental import pallas as pl
from jax.experimental.pallas import tpu as pltpu


def _round_up(n, m):
    return ((n + m - 1) // m) * m


def mog_netD_kernel(x_ref, w0_ref, wh_ref, b_ref, wf_ref, bf_ref,
                    inter_ref, out_ref):
    mm_dtype = w0_ref.dtype
    bias = b_ref[...]                       # (4, H) f32, loaded once per tile

    # ----- main: Linear(indim, H) + Tanh -----
    h = jnp.dot(x_ref[...], w0_ref[...], preferred_element_type=jnp.float32)
    h = jnp.tanh(h + bias[0:1, :])

    # ----- main: 3 x (Linear(H, H) + Tanh), weights packed as (3, H, H) -----
    for l in range(3):
        h = jnp.dot(h.astype(mm_dtype), wh_ref[l],
                    preferred_element_type=jnp.float32)
        h = jnp.tanh(h + bias[l + 1:l + 2, :])

    inter_ref[...] = h.astype(inter_ref.dtype)

    # ----- final: Linear(H, 1) as VPU mul + lane reduction (no N=1 matmul) --
    out = jnp.sum(h * wf_ref[...], axis=-1, keepdims=True) + bf_ref[...]
    out_ref[...] = out.astype(out_ref.dtype)


def _prepare_params(params, indim, compute_dtype):
    """Pad hidden width to a 128 multiple, pack weights/biases, cast matmul
    operands to compute_dtype (biases / final weight stay f32 for the VPU)."""
    hidim = params["w0"].shape[1]
    H = _round_up(max(hidim, 128), 128)

    def pad2(a, rows, cols):
        return jnp.pad(a, ((0, rows - a.shape[0]), (0, cols - a.shape[1])))

    w0 = pad2(params["w0"], indim, H).astype(compute_dtype)          # (indim, H)
    wh = jnp.stack([pad2(params[f"w{i}"], H, H)
                    for i in (1, 2, 3)]).astype(compute_dtype)       # (3, H, H)
    b = jnp.concatenate([pad2(params[f"b{i}"], 1, H)
                         for i in range(4)], axis=0)                 # (4, H) f32
    wf = pad2(params["wf"].T, 1, H)                                  # (1, H) f32
    bf = params["bf"]                                                # (1, 1) f32
    return w0, wh, b, wf, bf, H, hidim


def mog_netD_forward(x, params, *, compute_dtype=jnp.float32, block_b=512):
    """x: (B, indim) float32. params: dict of pre-transposed weights/biases
    ((in, out) layout). Returns (inter (B, hidim), output (B, 1)) matching the
    PyTorch module."""
    B, indim = x.shape
    w0, wh, b, wf, bf, H, hidim = _prepare_params(params, indim, compute_dtype)

    # Batch tiling: TB divisible by 8 (sublane), B padded up to a TB multiple.
    TB = min(block_b, _round_up(B, 8))
    B_pad = _round_up(B, TB)
    xp = x if B_pad == B else jnp.pad(x, ((0, B_pad - B), (0, 0)))
    xp = xp.astype(compute_dtype)

    grid = (B_pad // TB,)

    inter, out = pl.pallas_call(
        mog_netD_kernel,
        out_shape=(
            jax.ShapeDtypeStruct((B_pad, H), jnp.float32),
            jax.ShapeDtypeStruct((B_pad, 1), jnp.float32),
        ),
        grid=grid,
        in_specs=[
            pl.BlockSpec((TB, indim), lambda i: (i, 0)),      # x (pipelined)
            pl.BlockSpec((indim, H), lambda i: (0, 0)),       # w0 (resident)
            pl.BlockSpec((3, H, H), lambda i: (0, 0, 0)),     # w1..w3 packed
            pl.BlockSpec((4, H), lambda i: (0, 0)),           # b0..b3 packed
            pl.BlockSpec((1, H), lambda i: (0, 0)),           # wf (row)
            pl.BlockSpec((1, 1), lambda i: (0, 0)),           # bf
        ],
        out_specs=(
            pl.BlockSpec((TB, H), lambda i: (i, 0)),          # inter (padded)
            pl.BlockSpec((TB, 1), lambda i: (i, 0)),          # output
        ),
        compiler_params=pltpu.CompilerParams(
            dimension_semantics=("parallel",)),
    )(xp, w0, wh, b, wf, bf)

    return inter[:B, :hidim], out[:B]


def init_params(key, indim, hidim):
    """Deterministic synthetic parameters. PyTorch nn.Linear stores weight as
    (out, in); we store the transpose (in, out) so the kernel does x @ W + b."""
    ks = jax.random.split(key, 10)
    scale = 0.1
    return {
        "w0": scale * jax.random.normal(ks[0], (indim, hidim), jnp.float32),
        "b0": scale * jax.random.normal(ks[1], (1, hidim), jnp.float32),
        "w1": scale * jax.random.normal(ks[2], (hidim, hidim), jnp.float32),
        "b1": scale * jax.random.normal(ks[3], (1, hidim), jnp.float32),
        "w2": scale * jax.random.normal(ks[4], (hidim, hidim), jnp.float32),
        "b2": scale * jax.random.normal(ks[5], (1, hidim), jnp.float32),
        "w3": scale * jax.random.normal(ks[6], (hidim, hidim), jnp.float32),
        "b3": scale * jax.random.normal(ks[7], (1, hidim), jnp.float32),
        "wf": scale * jax.random.normal(ks[8], (hidim, 1), jnp.float32),
        "bf": scale * jax.random.normal(ks[9], (1, 1), jnp.float32),
    }


def reference_forward(x, params):
    h = jnp.tanh(x @ params["w0"] + params["b0"])
    h = jnp.tanh(h @ params["w1"] + params["b1"])
    h = jnp.tanh(h @ params["w2"] + params["b2"])
    h = jnp.tanh(h @ params["w3"] + params["b3"])
    out = h @ params["wf"] + params["bf"]
    return h, out.reshape(-1, 1)


if __name__ == "__main__":
    B, indim, hidim = 8, 4, 32
    key = jax.random.PRNGKey(0)
    kx, kp = jax.random.split(key)
    x = jax.random.normal(kx, (B, indim), jnp.float32)
    params = init_params(kp, indim, hidim)

    ref_inter, ref_out = reference_forward(x, params)

    # f32 matmul path: bit-tight check against the pure-JAX reference.
    inter, out = mog_netD_forward(x, params, compute_dtype=jnp.float32)
    jax.block_until_ready((inter, out))
    assert inter.shape == (B, hidim) and out.shape == (B, 1)
    assert jnp.allclose(inter, ref_inter, atol=1e-5, rtol=1e-5)
    assert jnp.allclose(out, ref_out, atol=1e-5, rtol=1e-5)

    # bf16 matmul inputs (v6e/v7x MXU fast path), f32 accumulate: looser tol.
    inter_bf, out_bf = mog_netD_forward(x, params, compute_dtype=jnp.bfloat16)
    jax.block_until_ready((inter_bf, out_bf))
    assert jnp.allclose(inter_bf, ref_inter, atol=3e-2, rtol=3e-2)
    assert jnp.allclose(out_bf, ref_out, atol=3e-2, rtol=3e-2)

    print("KERNEL_OK")
</pallas_src>

<mosaic_0001>
module attributes {stable_mosaic.version = 11 : i64} {
  func.func @mog_netD_kernel(%arg0: i32, %arg1: memref<8x4xf32, #tpu.memory_space<vmem>>, %arg2: memref<4x128xf32, #tpu.memory_space<vmem>>, %arg3: memref<3x128x128xf32, #tpu.memory_space<vmem>>, %arg4: memref<4x128xf32, #tpu.memory_space<vmem>>, %arg5: memref<1x128xf32, #tpu.memory_space<vmem>>, %arg6: memref<1x1xf32, #tpu.memory_space<vmem>>, %arg7: memref<8x128xf32, #tpu.memory_space<vmem>>, %arg8: memref<8x1xf32, #tpu.memory_space<vmem>>) attributes {dimension_semantics = [#tpu.dimension_semantics<parallel>], iteration_bounds = array<i64: 1>, scalar_prefetch = 0 : i64, scratch_operands = 0 : i64, tpu.core_type = #tpu.core_type<tc>, window_params = [{transform_indices = @transform_0, window_bounds = array<i64: 8, 4>}, {pipeline_mode = #tpu.pipeline_mode<synchronous>, transform_indices = @transform_1, window_bounds = array<i64: 4, 128>}, {pipeline_mode = #tpu.pipeline_mode<synchronous>, transform_indices = @transform_2, window_bounds = array<i64: 3, 128, 128>}, {pipeline_mode = #tpu.pipeline_mode<synchronous>, transform_indices = @transform_3, window_bounds = array<i64: 4, 128>}, {pipeline_mode = #tpu.pipeline_mode<synchronous>, transform_indices = @transform_4, window_bounds = array<i64: 1, 128>}, {pipeline_mode = #tpu.pipeline_mode<synchronous>, transform_indices = @transform_5, window_bounds = array<i64: 1, 1>}, {transform_indices = @transform_6, window_bounds = array<i64: 8, 128>}, {transform_indices = @transform_7, window_bounds = array<i64: 8, 1>}]} {
    %c0 = arith.constant 0 : index
    %c0_0 = arith.constant 0 : index
    %0 = vector.load %arg4[%c0, %c0_0] : memref<4x128xf32, #tpu.memory_space<vmem>>, vector<4x128xf32>
    %c0_1 = arith.constant 0 : index
    %c0_2 = arith.constant 0 : index
    %1 = vector.load %arg1[%c0_1, %c0_2] : memref<8x4xf32, #tpu.memory_space<vmem>>, vector<8x4xf32>
    %c0_3 = arith.constant 0 : index
    %c0_4 = arith.constant 0 : index
    %2 = vector.load %arg2[%c0_3, %c0_4] : memref<4x128xf32, #tpu.memory_space<vmem>>, vector<4x128xf32>
    %cst = arith.constant dense<0.000000e+00> : vector<8x128xf32>
    %3 = tpu.matmul %1, %2, %cst {dimension_numbers = #tpu.dot_dimension_numbers<[1], [0], [0], [1], [0, 0, 1, 1], [], []>} : vector<8x4xf32>, vector<4x128xf32>, vector<8x128xf32> -> vector<8x128xf32>
    %4 = vector.extract_strided_slice %0 {offsets = [0, 0], sizes = [1, 128], strides = [1, 1]} : vector<4x128xf32> to vector<1x128xf32>
    %5 = vector.broadcast %4 : vector<1x128xf32> to vector<8x128xf32>
    %6 = arith.addf %3, %5 : vector<8x128xf32>
    %7 = math.tanh %6 : vector<8x128xf32>
    %c0_5 = arith.constant 0 : index
    %c0_6 = arith.constant 0 : index
    %c0_7 = arith.constant 0 : index
    %8 = vector.load %arg3[%c0_5, %c0_6, %c0_7] : memref<3x128x128xf32, #tpu.memory_space<vmem>>, vector<1x128x128xf32>
    %9 = vector.shape_cast %8 : vector<1x128x128xf32> to vector<128x128xf32>
    %cst_8 = arith.constant dense<0.000000e+00> : vector<8x128xf32>
    %10 = tpu.matmul %7, %9, %cst_8 {dimension_numbers = #tpu.dot_dimension_numbers<[1], [0], [0], [1], [0, 0, 1, 1], [], []>} : vector<8x128xf32>, vector<128x128xf32>, vector<8x128xf32> -> vector<8x128xf32>
    %11 = vector.extract_strided_slice %0 {offsets = [1, 0], sizes = [1, 128], strides = [1, 1]} : vector<4x128xf32> to vector<1x128xf32>
    %12 = vector.broadcast %11 : vector<1x128xf32> to vector<8x128xf32>
    %13 = arith.addf %10, %12 : vector<8x128xf32>
    %14 = math.tanh %13 : vector<8x128xf32>
    %c1 = arith.constant 1 : index
    %c0_9 = arith.constant 0 : index
    %c0_10 = arith.constant 0 : index
    %15 = vector.load %arg3[%c1, %c0_9, %c0_10] : memref<3x128x128xf32, #tpu.memory_space<vmem>>, vector<1x128x128xf32>
    %16 = vector.shape_cast %15 : vector<1x128x128xf32> to vector<128x128xf32>
    %cst_11 = arith.constant dense<0.000000e+00> : vector<8x128xf32>
    %17 = tpu.matmul %14, %16, %cst_11 {dimension_numbers = #tpu.dot_dimension_numbers<[1], [0], [0], [1], [0, 0, 1, 1], [], []>} : vector<8x128xf32>, vector<128x128xf32>, vector<8x128xf32> -> vector<8x128xf32>
    %18 = vector.extract_strided_slice %0 {offsets = [2, 0], sizes = [1, 128], strides = [1, 1]} : vector<4x128xf32> to vector<1x128xf32>
    %19 = vector.broadcast %18 : vector<1x128xf32> to vector<8x128xf32>
    %20 = arith.addf %17, %19 : vector<8x128xf32>
    %21 = math.tanh %20 : vector<8x128xf32>
    %c2 = arith.constant 2 : index
    %c0_12 = arith.constant 0 : index
    %c0_13 = arith.constant 0 : index
    %22 = vector.load %arg3[%c2, %c0_12, %c0_13] : memref<3x128x128xf32, #tpu.memory_space<vmem>>, vector<1x128x128xf32>
    %23 = vector.shape_cast %22 : vector<1x128x128xf32> to vector<128x128xf32>
    %cst_14 = arith.constant dense<0.000000e+00> : vector<8x128xf32>
    %24 = tpu.matmul %21, %23, %cst_14 {dimension_numbers = #tpu.dot_dimension_numbers<[1], [0], [0], [1], [0, 0, 1, 1], [], []>} : vector<8x128xf32>, vector<128x128xf32>, vector<8x128xf32> -> vector<8x128xf32>
    %25 = vector.extract_strided_slice %0 {offsets = [3, 0], sizes = [1, 128], strides = [1, 1]} : vector<4x128xf32> to vector<1x128xf32>
    %26 = vector.broadcast %25 : vector<1x128xf32> to vector<8x128xf32>
    %27 = arith.addf %24, %26 : vector<8x128xf32>
    %28 = math.tanh %27 : vector<8x128xf32>
    %c0_15 = arith.constant 0 : index
    %c0_16 = arith.constant 0 : index
    %29 = vector.load %arg7[%c0_15, %c0_16] : memref<8x128xf32, #tpu.memory_space<vmem>>, vector<8x128xf32>
    tpu.vector_store %arg7[%c0_15, %c0_16], %28 {strides = array<i32>} : memref<8x128xf32, #tpu.memory_space<vmem>>, vector<8x128xf32>,
    %c0_17 = arith.constant 0 : index
    %c0_18 = arith.constant 0 : index
    %30 = vector.load %arg5[%c0_17, %c0_18] : memref<1x128xf32, #tpu.memory_space<vmem>>, vector<1x128xf32>
    %31 = vector.broadcast %30 : vector<1x128xf32> to vector<8x128xf32>
    %32 = arith.mulf %28, %31 : vector<8x128xf32>
    %cst_19 = arith.constant dense<0.000000e+00> : vector<8xf32>
    %33 = vector.multi_reduction <add>, %32, %cst_19 [1] : vector<8x128xf32> to vector<8xf32>
    %34 = vector.shape_cast %33 : vector<8xf32> to vector<8x1xf32>
    %c0_20 = arith.constant 0 : index
    %c0_21 = arith.constant 0 : index
    %35 = vector.load %arg6[%c0_20, %c0_21] : memref<1x1xf32, #tpu.memory_space<vmem>>, vector<1x1xf32>
    %36 = vector.broadcast %35 : vector<1x1xf32> to vector<8x1xf32>
    %37 = arith.addf %34, %36 : vector<8x1xf32>
    %c0_22 = arith.constant 0 : index
    %c0_23 = arith.constant 0 : index
    %38 = vector.load %arg8[%c0_22, %c0_23] : memref<8x1xf32, #tpu.memory_space<vmem>>, vector<8x1xf32>
    tpu.vector_store %arg8[%c0_22, %c0_23], %37 {strides = array<i32>} : memref<8x1xf32, #tpu.memory_space<vmem>>, vector<8x1xf32>,
    return
  }
  func.func @transform_0(%arg0: i32) -> (i32, i32) {
    %c0_i32 = arith.constant 0 : i32
    %c0_i32_0 = arith.constant 0 : i32
    return %arg0, %c0_i32 : i32, i32
  }
  func.func @transform_1(%arg0: i32) -> (i32, i32) {
    %c0_i32 = arith.constant 0 : i32
    %c0_i32_0 = arith.constant 0 : i32
    %c0_i32_1 = arith.constant 0 : i32
    return %c0_i32, %c0_i32_0 : i32, i32
  }
  func.func @transform_2(%arg0: i32) -> (i32, i32, i32) {
    %c0_i32 = arith.constant 0 : i32
    %c0_i32_0 = arith.constant 0 : i32
    %c0_i32_1 = arith.constant 0 : i32
    %c0_i32_2 = arith.constant 0 : i32
    return %c0_i32, %c0_i32_0, %c0_i32_1 : i32, i32, i32
  }
  func.func @transform_3(%arg0: i32) -> (i32, i32) {
    %c0_i32 = arith.constant 0 : i32
    %c0_i32_0 = arith.constant 0 : i32
    %c0_i32_1 = arith.constant 0 : i32
    return %c0_i32, %c0_i32_0 : i32, i32
  }
  func.func @transform_4(%arg0: i32) -> (i32, i32) {
    %c0_i32 = arith.constant 0 : i32
    %c0_i32_0 = arith.constant 0 : i32
    %c0_i32_1 = arith.constant 0 : i32
    return %c0_i32, %c0_i32_0 : i32, i32
  }
  func.func @transform_5(%arg0: i32) -> (i32, i32) {
    %c0_i32 = arith.constant 0 : i32
    %c0_i32_0 = arith.constant 0 : i32
    %c0_i32_1 = arith.constant 0 : i32
    return %c0_i32, %c0_i32_0 : i32, i32
  }
  func.func @transform_6(%arg0: i32) -> (i32, i32) {
    %c0_i32 = arith.constant 0 : i32
    %c0_i32_0 = arith.constant 0 : i32
    return %arg0, %c0_i32 : i32, i32
  }
  func.func @transform_7(%arg0: i32) -> (i32, i32) {
    %c0_i32 = arith.constant 0 : i32
    %c0_i32_0 = arith.constant 0 : i32
    return %arg0, %c0_i32 : i32, i32
  }
}

</mosaic_0001>

<bundles_post_ra>
// kernel: tpu_custom_call.1
= control target key start
LH: loop header
LB: loop body
LE: loop exit
PB: predicated region body
PF: predicated region fallthrough
CT: control target
= control target key end

     0   :  { %s879_s0 = inlined_call_operand.vmem [shape: f32[8,4], index: 0, kind: input, shape index: {}]   ;;  %s880_s1 = inlined_call_operand.vmem [shape: f32[4,128], index: 1, kind: input, shape index: {}]   ;;  %s881_s2 = inlined_call_operand.hbm [shape: f32[3,128,128], index: 2, kind: input, shape index: {}]   ;;  %s882_s3 = inlined_call_operand.vmem [shape: f32[4,128], index: 3, kind: input, shape index: {}]   ;;  %s883_s4 = inlined_call_operand.vmem [shape: f32[1,128], index: 4, kind: input, shape index: {}]   ;;  %s884_s5 = inlined_call_operand.<no memory space> [shape: f32[1,1], index: 5, kind: input, shape index: {}]   ;;  %s885_s6 = inlined_call_operand.hbm [shape: f32[8,128], index: 6, kind: output, shape index: {0}]   ;;  %s886_s7 = inlined_call_operand.vmem [shape: f32[8,1], index: 7, kind: output, shape index: {1}]  }
   0x1   :  { %v13_v0 = vstv %s884_s5 }
   0x2   :  { %14 = vst [vmem:[#allocation2] sm:$0x1] %v13_v0 }
   0x3   :  { %15 = vsyncpa [#allocation4], 0 }
   0x4   :  { %16 = vsyncpa [#allocation5], 0  ;;  %s745_s26 = smov [#allocation3]   ;;  %s697_s30 = scalar_lea.hbm %s881_s2, 6144 }
   0x5   :  { %s26_s27 = sshll.u32 %s745_s26, 4  ;;  %p698_p0 = scmp.ne.s32.totalorder %s881_s2, %s697_s30  ;;  %s27_s27 = int_to_ptr.vmem [resolvable:$true] %s26_s27 }
   0x6   :  { %p701_p1 = scmp.lt.u32.totalorder %s697_s30, %s881_s2 }
   0x8   :  { %p703_p2 = pnand %p701_p1, %p698_p0 }
   0xa   :  { %706 = shalt.err (!%p703_p2)
}
   0xb   :  { %s707_s5 = scalar_lea.vmem %s27_s27, 6144  ;;  %p712_p4 = scmp.lt.s32.totalorder %s27_s27, %s27_s27 }
   0xc   :  { %p708_p3 = scmp.ne.s32.totalorder %s27_s27, %s707_s5  ;;  %p713_p5 = scmp.lt.s32.totalorder %s707_s5, %s707_s5 }
   0xe   :  { %p714_p6 = por %p713_p5, %p712_p4 }
  0x10   :  { %p715_p7 = pnand %p714_p6, %p708_p3 }
  0x12   :  { %718 = shalt.err (!%p715_p7)
}
  0x13   :  { %s746_s12 = smov 128   ;;  %s747_s13 = smov 8  }
  0x14   :  { %32 = dma.hbm_to_vmem [thread:$0]  %s881_s2, 6144, %s27_s27, [#allocation4], %s746_s12, %s746_s12, %s747_s13  }
  0x15   :  { %741 = dma.done.wait [#allocation4], 6144  }
  0x16   :  { %742 = vsyncadd [#allocation4], 4294961152  ;;  %v748_v1 = vmov 0.0   ;;  %vm749_vm0 = vmmov 0   ;;  %v750_v2 = vmov 0.0|0.0   ;;  %vm53_vm1 = vcmask 1043456  }
  0x17   :  { %500 = vmatprep.subr.mxu0 %v748_v1  ;;  %502 = vmatprep.mubr.msk.f32.mxu0 %vm749_vm0, %v748_v1  ;;  %vm49_vm2 = vcmask 31744   ;;  %v44_v3 = vld [vmem:[%s880_s1] sm:$0xf]  ;;  %v129_v6 = vld [vmem:[#allocation3 + $0x8] sm:$0xff]  ;;  %v130_v7 = vld [vmem:[#allocation3 + $0x10] sm:$0xff]  ;;  %v45_v44 = vlaneseq  ;;  %s751_s20 = smov [#allocation6]  }
  0x18   :  { %610 = vmatprep.subr.bf16.mxu1 %v750_v2  ;;  %537 = vmatprep.mubr.msk.f32.mxu1 %vm749_vm0, %v748_v1  ;;  %v43_v4 = vld [vmem:[%s879_s0] sm:$0xff]  ;;  %v133_v12 = vld [vmem:[#allocation3 + $0x28] sm:$0xff]  ;;  %v134_v14 = vld [vmem:[#allocation3 + $0x30] sm:$0xff]  ;;  %s430_s21 = sshll.u32 %s751_s20, 4  ;;  %s431_s21 = int_to_ptr.vmem [resolvable:$true] %s430_s21 }
  0x19   :  { %v128_v5 = vld [vmem:[#allocation3] sm:$0xff]  ;;  %501 = vmatpush3.msk.msra.mxu0 %vm53_vm1, %v44_v3  ;;  %v131_v8 = vld [vmem:[#allocation3 + $0x18] sm:$0xff]  ;;  %v137_v18 = vld [vmem:[#allocation3 + $0x48] sm:$0xff]  ;;  %v835_v45 = vshrl.u32 %v45_v44, 7  ;;  %s719_s22 = scalar_lea.vmem %s431_s21, 128  ;;  %p724_p9 = scmp.lt.s32.totalorder %s431_s21, %s431_s21 }
  0x1a   :  { %503 = vmatmul.mubr.msk.f32.vlgmr.msra.gmra.mrb[0].mxu0 %vm49_vm2, %v43_v4  ;;  %v611_v9 = vpack.c.bf16 %v129_v6, %v128_v5  ;;  %634 = vmatprep.subr.bf16.mxu0 %v750_v2  ;;  %v614_v10 = vpack.c.bf16 %v131_v8, %v130_v7  ;;  %v132_v11 = vld [vmem:[#allocation3 + $0x20] sm:$0xff]  ;;  %v135_v15 = vld [vmem:[#allocation3 + $0x38] sm:$0xff]  ;;  %v138_v20 = vld [vmem:[#allocation3 + $0x50] sm:$0xff]  ;;  %p720_p8 = scmp.ne.s32.totalorder %s431_s21, %s719_s22  ;;  %p725_p10 = scmp.lt.s32.totalorder %s719_s22, %s719_s22 }
  0x1b   :  { %572 = vmatprep.mubr.msk.f32.mxu0 %vm749_vm0, %v748_v1  ;;  %v617_v13 = vpack.c.bf16 %v133_v12, %v132_v11  ;;  %v620_v16 = vpack.c.bf16 %v135_v15, %v134_v14  ;;  %v136_v17 = vld [vmem:[#allocation3 + $0x40] sm:$0xff]  ;;  %v139_v21 = vld [vmem:[#allocation3 + $0x58] sm:$0xff]  ;;  %v141_v24 = vld [vmem:[#allocation3 + $0x68] sm:$0xff]  ;;  %v47_v46 = vsub.s32 0, %v835_v45  ;;  %v146_v14 = vsub.s32 1, %v835_v45 }
  0x1c   :  { %612 = vmatpush3.bf16.msra.mxu1 %v611_v9  ;;  %v623_v19 = vpack.c.bf16 %v137_v18, %v136_v17  ;;  %v626_v22 = vpack.c.bf16 %v139_v21, %v138_v20  ;;  %v140_v23 = vld [vmem:[#allocation3 + $0x60] sm:$0xff]  ;;  %v142_v26 = vld [vmem:[#allocation3 + $0x70] sm:$0xff]  ;;  %v143_v27 = vld [vmem:[#allocation3 + $0x78] sm:$0xff]  ;;  %p726_p11 = por %p725_p10, %p724_p9 }
  0x1d   :  { %613 = vmatprep.subr.bf16.mxu1 %v750_v2  ;;  %v629_v25 = vpack.c.bf16 %v141_v24, %v140_v23  ;;  %v632_v28 = vpack.c.bf16 %v143_v27, %v142_v26  ;;  %v220_v29 = vld [vmem:[#allocation3 + $0x80] sm:$0xff]  ;;  %v221_v30 = vld [vmem:[#allocation3 + $0x88] sm:$0xff]  ;;  %v222_v31 = vld [vmem:[#allocation3 + $0x90] sm:$0xff] }
  0x1e   :  { %v635_v32 = vpack.c.bf16 %v221_v30, %v220_v29  ;;  %v223_v33 = vld [vmem:[#allocation3 + $0x98] sm:$0xff]  ;;  %v224_v35 = vld [vmem:[#allocation3 + $0xa0] sm:$0xff]  ;;  %v225_v36 = vld [vmem:[#allocation3 + $0xa8] sm:$0xff]  ;;  %v238_v29 = vsub.s32 2, %v835_v45  ;;  %p727_p12 = pnand %p726_p11, %p720_p8 }
  0x1f   :  { %v638_v34 = vpack.c.bf16 %v223_v33, %v222_v31  ;;  %v641_v37 = vpack.c.bf16 %v225_v36, %v224_v35  ;;  %v226_v38 = vld [vmem:[#allocation3 + $0xb0] sm:$0xff]  ;;  %v227_v39 = vld [vmem:[#allocation3 + $0xb8] sm:$0xff]  ;;  %v228_v41 = vld [vmem:[#allocation3 + $0xc0] sm:$0xff]  ;;  %v330_v35 = vsub.s32 3, %v835_v45 }
  0x20   :  { %615 = vmatpush3.bf16.msra.mxu1 %v614_v10  ;;  %636 = vmatpush3.bf16.msra.mxu0 %v635_v32  ;;  %v644_v40 = vpack.c.bf16 %v227_v39, %v226_v38  ;;  %v229_v42 = vld [vmem:[#allocation3 + $0xc8] sm:$0xff]  ;;  %v841_v47 = vld [vmem:[%s882_s3] sm:$0xf]  ;;  %v230_v53 = vld [vmem:[#allocation3 + $0xd0] sm:$0xff] }
  0x21   :  { %616 = vmatprep.subr.bf16.mxu1 %v750_v2  ;;  %637 = vmatprep.subr.bf16.mxu0 %v750_v2  ;;  %v647_v43 = vpack.c.bf16 %v229_v42, %v228_v41  ;;  %v48_v48 = vrot.slane %v841_v47, %v47_v46  ;;  %v231_v54 = vld [vmem:[#allocation3 + $0xd8] sm:$0xff]  ;;  %v232_v56 = vld [vmem:[#allocation3 + $0xe0] sm:$0xff]  ;;  %v233_v57 = vld [vmem:[#allocation3 + $0xe8] sm:$0xff]  ;;  %v147_v15 = vrot.slane %v841_v47, %v146_v14 }
  0x22   :  { %v650_v55 = vpack.c.bf16 %v231_v54, %v230_v53  ;;  %v653_v58 = vpack.c.bf16 %v233_v57, %v232_v56  ;;  %v234_v59 = vld [vmem:[#allocation3 + $0xf0] sm:$0xff]  ;;  %v235_v60 = vld [vmem:[#allocation3 + $0xf8] sm:$0xff]  ;;  %v312_v62 = vld [vmem:[#allocation3 + $0x100] sm:$0xff]  ;;  %v239_v30 = vrot.slane %v841_v47, %v238_v29  ;;  %v331_v36 = vrot.slane %v841_v47, %v330_v35 }
  0x23   :  { %v656_v61 = vpack.c.bf16 %v235_v60, %v234_v59  ;;  %v313_v63 = vld [vmem:[#allocation3 + $0x108] sm:$0xff]  ;;  %v314_v0 = vld [vmem:[#allocation3 + $0x110] sm:$0xff]  ;;  %v315_v3 = vld [vmem:[#allocation3 + $0x118] sm:$0xff] }
  0x24   :  { %618 = vmatpush3.bf16.msra.mxu1 %v617_v13  ;;  %639 = vmatpush3.bf16.msra.mxu0 %v638_v34  ;;  %v662_v4 = vpack.c.bf16 %v315_v3, %v314_v0  ;;  %v316_v5 = vld [vmem:[#allocation3 + $0x120] sm:$0xff]  ;;  %v317_v6 = vld [vmem:[#allocation3 + $0x128] sm:$0xff]  ;;  %v318_v8 = vld [vmem:[#allocation3 + $0x130] sm:$0xff] }
  0x25   :  { %619 = vmatprep.subr.bf16.mxu1 %v750_v2  ;;  %640 = vmatprep.subr.bf16.mxu0 %v750_v2  ;;  %v665_v7 = vpack.c.bf16 %v317_v6, %v316_v5  ;;  %v319_v9 = vld [vmem:[#allocation3 + $0x138] sm:$0xff]  ;;  %v320_v11 = vld [vmem:[#allocation3 + $0x140] sm:$0xff]  ;;  %v321_v12 = vld [vmem:[#allocation3 + $0x148] sm:$0xff] }
  0x26   :  { %v668_v10 = vpack.c.bf16 %v319_v9, %v318_v8  ;;  %v671_v13 = vpack.c.bf16 %v321_v12, %v320_v11  ;;  %v322_v20 = vld [vmem:[#allocation3 + $0x150] sm:$0xff]  ;;  %v323_v21 = vld [vmem:[#allocation3 + $0x158] sm:$0xff]  ;;  %v324_v23 = vld [vmem:[#allocation3 + $0x160] sm:$0xff] }
  0x27   :  { %v325_v24 = vld [vmem:[#allocation3 + $0x168] sm:$0xff]  ;;  %v326_v26 = vld [vmem:[#allocation3 + $0x170] sm:$0xff]  ;;  %v327_v27 = vld [vmem:[#allocation3 + $0x178] sm:$0xff] }
  0x28   :  { %621 = vmatpush3.bf16.msra.mxu1 %v620_v16  ;;  %642 = vmatpush3.bf16.msra.mxu0 %v641_v37 }
  0x29   :  { %622 = vmatprep.subr.bf16.mxu1 %v750_v2  ;;  %643 = vmatprep.subr.bf16.mxu0 %v750_v2 }
  0x2c   :  { %624 = vmatpush3.bf16.msra.mxu1 %v623_v19  ;;  %645 = vmatpush3.bf16.msra.mxu0 %v644_v40 }
  0x2d   :  { %625 = vmatprep.subr.bf16.mxu1 %v750_v2  ;;  %646 = vmatprep.subr.bf16.mxu0 %v750_v2 }
  0x30   :  { %627 = vmatpush3.bf16.msra.mxu1 %v626_v22  ;;  %648 = vmatpush3.bf16.msra.mxu0 %v647_v43  ;;  %v674_v22 = vpack.c.bf16 %v323_v21, %v322_v20 }
  0x31   :  { %628 = vmatprep.subr.bf16.mxu1 %v750_v2  ;;  %649 = vmatprep.subr.bf16.mxu0 %v750_v2 }
  0x34   :  { %630 = vmatpush3.bf16.msra.mxu1 %v629_v25  ;;  %651 = vmatpush3.bf16.msra.mxu0 %v650_v55  ;;  %v677_v25 = vpack.c.bf16 %v325_v24, %v324_v23 }
  0x35   :  { %631 = vmatprep.subr.bf16.mxu1 %v750_v2  ;;  %652 = vmatprep.subr.bf16.mxu0 %v750_v2 }
  0x38   :  { %633 = vmatpush3.bf16.msra.mxu1 %v632_v28  ;;  %654 = vmatpush3.bf16.msra.mxu0 %v653_v58  ;;  %v680_v28 = vpack.c.bf16 %v327_v27, %v326_v26 }
  0x39   :  { %658 = vmatprep.subr.bf16.mxu1 %v750_v2  ;;  %655 = vmatprep.subr.bf16.mxu0 %v750_v2 }
  0x3c   :  { %657 = vmatpush3.bf16.msra.mxu0 %v656_v61 }
  0xed   :  { %v123_v49 = vpop.f32.mrb[0].mxu0 }
  0xee   :  { %v124_v50 = vadd.f32 %v123_v49, %v48_v48  ;;  %v504_v51 = vpop.f32.mrb[1].mxu0 }
  0xf0   :  { %689 = vtanh.f32 %v124_v50 }
  0xfa   :  { %v690_v52 = vpop.eup %689 }
  0xfb   :  { %538 = vmatmul.mubr.f32.vlgmr.msra.gmra.mrb[0].mxu1 %v690_v52 }
  0xfc   :  { %607 = vmatprep.mubr.msk.f32.mxu1 %vm749_vm0, %v748_v1  ;;  %v659_v1 = vpack.c.bf16 %v313_v63, %v312_v62 }
  0xfe   :  { %660 = vmatpush3.bf16.msra.mxu1 %v659_v1 }
  0xff   :  { %661 = vmatprep.subr.bf16.mxu1 %v750_v2 }
 0x102   :  { %663 = vmatpush3.bf16.msra.mxu1 %v662_v4 }
 0x103   :  { %664 = vmatprep.subr.bf16.mxu1 %v750_v2 }
 0x106   :  { %666 = vmatpush3.bf16.msra.mxu1 %v665_v7 }
 0x107   :  { %667 = vmatprep.subr.bf16.mxu1 %v750_v2 }
 0x10a   :  { %669 = vmatpush3.bf16.msra.mxu1 %v668_v10 }
 0x10b   :  { %670 = vmatprep.subr.bf16.mxu1 %v750_v2 }
 0x10e   :  { %672 = vmatpush3.bf16.msra.mxu1 %v671_v13 }
 0x10f   :  { %673 = vmatprep.subr.bf16.mxu1 %v750_v2 }
 0x112   :  { %675 = vmatpush3.bf16.msra.mxu1 %v674_v22 }
 0x113   :  { %676 = vmatprep.subr.bf16.mxu1 %v750_v2 }
 0x116   :  { %678 = vmatpush3.bf16.msra.mxu1 %v677_v25 }
 0x117   :  { %679 = vmatprep.subr.bf16.mxu1 %v750_v2  ;;  %v445_v2 = vld [vmem:[%s883_s4] ss:$0 sm:$0xff] }
 0x11a   :  { %681 = vmatpush3.bf16.msra.mxu1 %v680_v28 }
 0x1ce   :  { %v214_v16 = vpop.f32.mrb[0].mxu1 }
 0x1cf   :  { %v215_v17 = vadd.f32 %v214_v16, %v147_v15  ;;  %v539_v18 = vpop.f32.mrb[1].mxu1 }
 0x1d1   :  { %691 = vtanh.f32 %v215_v17 }
 0x1db   :  { %v692_v19 = vpop.eup %691 }
 0x1dc   :  { %573 = vmatmul.mubr.f32.vlgmr.msra.gmra.mrb[2].mxu0 %v692_v19 }
 0x2af   :  { %v306_v31 = vpop.f32.mrb[2].mxu0 }
 0x2b0   :  { %v307_v32 = vadd.f32 %v306_v31, %v239_v30  ;;  %v574_v33 = vpop.f32.mrb[3].mxu0 }
 0x2b2   :  { %693 = vtanh.f32 %v307_v32 }
 0x2bc   :  { %v694_v34 = vpop.eup %693 }
 0x2bd   :  { %608 = vmatmul.mubr.f32.vlgmr.msra.gmra.mrb[2].mxu1 %v694_v34 }
 0x390   :  { %v398_v37 = vpop.f32.mrb[2].mxu1 }
 0x391   :  { %v399_v38 = vadd.f32 %v398_v37, %v331_v36  ;;  %v609_v39 = vpop.f32.mrb[3].mxu1 }
 0x393   :  { %695 = vtanh.f32 %v399_v38 }
 0x39d   :  { %v696_v40 = vpop.eup %695 }
 0x39e   :  { %403 = vst [vmem:[#allocation6] sm:$0xff] %v696_v40  ;;  %v411_v41 = vmul.f32 %v696_v40, %v445_v2 }
 0x3a0   :  { %412 = vadd.xlane.f32.xlu0 %v411_v41 }
 0x3a1   :  { %730 = shalt.err (!%p727_p12)
}
 0x3a2   :  { %s731_s25 = scalar_lea.hbm %s885_s6, 128 }
 0x3a3   :  { %p732_p13 = scmp.ne.s32.totalorder %s885_s6, %s731_s25  ;;  %p735_p0 = scmp.lt.u32.totalorder %s731_s25, %s885_s6 }
 0x3a5   :  { %p737_p1 = pnand %p735_p0, %p732_p13 }
 0x3a7   :  { %740 = shalt.err (!%p737_p1)
}
 0x3a8   :  { %433 = dma.vmem_to_hbm [thread:$0]  %s431_s21, 128, %s885_s6, [#allocation5]   ;;  %v446_v42 = vld [vmem:[#allocation2] ss:$0 sm:$0xff]  ;;  %vm422_vm3 = vcmask 7168  }
 0x42d   :  { %v413_v43 = vpop.xlane.xlu0 %412 }
 0x42e   :  { %v421_v44 = vadd.f32 %v446_v42, %v413_v43 }
 0x430   :  { %423 = vst.msk [vmem:[%s886_s7] sm:$0xff] %vm422_vm3, %v421_v44 }
 0x431   :  { %743 = dma.done.wait [#allocation5], 128  }
 0x432   :  { %744 = vsyncadd [#allocation5], 4294967168 }
 0x433   :  { %441 = vsyncpa [#allocation4], 1 }
 0x434   :  { %442 = vsyncpa [#allocation5], 1 }

</bundles_post_ra>
